<compile_context>
chip_gen: v7x
topology: tpu7x:2x2x1
jax: 0.10.0
libtpu: 0.0.40
codegen_flags: <defaults>
</compile_context>

<pallas_src>
import functools
import math

import jax
import jax.numpy as jnp
from jax.experimental import pallas as pl
from jax.experimental.pallas import tpu as pltpu


def _kernel(x_ref, b_ref, o_ref, *, scale):
    # Compute in f32: the kernel is HBM-BW bound, so the upcast is free and it
    # matches PyTorch's promotion when bias is an f32 parameter.
    y = x_ref[...].astype(jnp.float32) + b_ref[...].astype(jnp.float32)
    # NOTE: the PyTorch reference hard-codes negative_slope=0.2 inside
    # F.leaky_relu and ignores the module's `negative_slope`; we match that.
    y = jnp.where(y >= 0, y, y * 0.2)
    o_ref[...] = (y * scale).astype(o_ref.dtype)


_TARGET_BLOCK_BYTES = 8 * 1024 * 1024   # ~8 MiB x-tile -> ~32-34 MiB working set
_MAX_TC = 4096                          # channel tile cap (multiple of 128)


def _vmem_limit_bytes(requested: int) -> int:
    """Generation-aware VMEM clamp: ~48 MiB on v7x (64 MiB phys), ~96 MiB on v5e/v6e."""
    try:
        cap = int(pltpu.get_tpu_info().vmem_capacity_bytes)
    except Exception:
        cap = 64 * 1024 * 1024          # conservative (v7x per-TC)
    hi = 96 * 1024 * 1024 if cap >= 100 * 1024 * 1024 else 48 * 1024 * 1024
    return int(min(max(requested, 32 * 1024 * 1024), hi))


def fused_leaky_relu(x, bias, negative_slope: float = 0.2, scale: float = 2 ** 0.5,
                     onnx_trace: bool = False, *, donate_input: bool = False):
    """x: (N, C), bias: (C,). Returns leaky_relu(x + bias, 0.2) * scale.

    `negative_slope` is accepted for API parity but (like the PyTorch
    reference) the slope is hard-coded to 0.2.  Set donate_input=True (and
    donate x at your jit boundary) to alias x's HBM buffer to the output.
    """
    del negative_slope, onnx_trace
    N, C = x.shape
    assert bias.shape == (C,)
    dtype = x.dtype
    bpe = jnp.dtype(dtype).itemsize

    # ---- lane-dense folding whenever C is not a multiple of 128 ----
    # An output last dim that is not a multiple of 128 lowers to masked partial
    # stores (vst.msk) on every row -- the biggest single lever for mem-bound
    # kernels.  Fold k rows into the lane axis; pure layout plumbing.
    fold = 1
    if C % 128 != 0:
        k = 128 // math.gcd(C, 128)     # smallest k with (k * C) % 128 == 0
        if k > 1 and N % k == 0:
            fold = k
    # TODO(synk): when N % k != 0, pad N up to a multiple of k in the wrapper
    # (pad + slice) so narrow / odd C still gets a lane-dense layout.
    if fold > 1:
        xw = x.reshape(N // fold, fold * C)
        bw = jnp.tile(bias, fold)
    else:
        xw = x
        bw = bias
    Nw, Cw = xw.shape
    total_bytes = Nw * Cw * bpe

    # ---- channel tile: multiple of 128 (or full extent); ragged edge masked ----
    tc = _MAX_TC if Cw > _MAX_TC else Cw

    # ---- row tile: as big as the budget allows, rounded to sublane packing ----
    pack = max(8, 32 // bpe)            # 8 for f32, 16 for bf16, 32 for int8/fp8
    if Nw < pack:
        tn = Nw                         # full extent (legal block)
    else:
        rows = max(pack, _TARGET_BLOCK_BYTES // max(tc * bpe, 1))
        tn = min(rows, Nw)
        tn -= tn % pack
        tn = max(tn, pack)
        # v7x has 2 TensorCores; a 1x1 grid runs on one of them.  If the array
        # is big enough to matter, split rows so the "parallel" axis has >= 2
        # blocks (no effect on v5e/v6e, which have 1 TC).
        if tn >= Nw and Cw <= tc and total_bytes > (2 << 20):
            half = -(-Nw // 2)
            half = ((half + pack - 1) // pack) * pack
            if half < Nw:
                tn = half

    grid = (pl.cdiv(Nw, tn), pl.cdiv(Cw, tc))

    # Double-buffered x + out tiles plus bias slab + slack.
    block_bytes = tn * tc * bpe
    vmem_limit = _vmem_limit_bytes(4 * block_bytes + 4 * tc * 4 + (2 << 20))

    bias2d = bw.reshape(1, Cw).astype(jnp.float32)   # keep bias in f32

    extra = {}
    if donate_input:
        # Same block index map for x and out -> safe to alias; halves the HBM
        # footprint when the caller donates x.
        extra["input_output_aliases"] = {0: 0}

    out = pl.pallas_call(
        functools.partial(_kernel, scale=float(scale)),
        out_shape=jax.ShapeDtypeStruct((Nw, Cw), dtype),
        grid_spec=pltpu.PrefetchScalarGridSpec(
            num_scalar_prefetch=0,
            grid=grid,
            in_specs=[
                pl.BlockSpec((tn, tc), lambda i, j: (i, j)),   # activation tile
                pl.BlockSpec((1, tc), lambda i, j: (0, j)),    # bias slab
            ],
            out_specs=pl.BlockSpec((tn, tc), lambda i, j: (i, j)),
        ),
        compiler_params=pltpu.CompilerParams(
            dimension_semantics=("parallel", "parallel"),
            vmem_limit_bytes=vmem_limit,
        ),
        # TODO(synk): sweep pipeline_mode=pl.Buffered(3) on the activation spec
        # for v7x if an xprof trace shows exposed DMA at ~2.5 us steps.
        **extra,
    )(xw, bias2d)

    if fold > 1:
        out = out.reshape(N, C)
    return out


class FusedLeakyReLU:
    """JAX counterpart of the PyTorch module (deterministic init)."""

    def __init__(self, channel, negative_slope=0.2, scale=2 ** 0.5, onnx_trace=False):
        # nn.Parameter(torch.zeros(channel)) -> deterministic zeros of shape (channel,)
        self.bias = jnp.zeros((channel,), dtype=jnp.float32)
        self.negative_slope = negative_slope
        self.scale = scale
        self.onnx_trace = onnx_trace

    def __call__(self, x):
        return fused_leaky_relu(x, self.bias, self.negative_slope, self.scale,
                                self.onnx_trace)


def _ref(x, bias, scale=2 ** 0.5):
    y = x.astype(jnp.float32) + bias.astype(jnp.float32)[None, :]
    return (jnp.where(y >= 0, y, y * 0.2) * scale).astype(x.dtype)


if __name__ == "__main__":
    key = jax.random.PRNGKey(0)
    kx, kb, kx2, kb2, kx3, kb3 = jax.random.split(key, 6)

    # Case 1: small, narrow-C shape (exercises the lane-dense fold path, k=4).
    N, C = 8, 32
    x = jax.random.normal(kx, (N, C), dtype=jnp.float32)
    mod = FusedLeakyReLU(channel=C)
    mod.bias = jax.random.normal(kb, (C,), dtype=jnp.float32) * 0.1
    out = jax.block_until_ready(mod(x))
    assert out.shape == (N, C) and out.dtype == x.dtype
    assert jnp.allclose(out, _ref(x, mod.bias), atol=1e-6, rtol=1e-6)

    # Case 2: ragged row count + C not a multiple of 128 (extended fold, k=2),
    # run through jit with donated input to exercise input_output_aliases.
    N2, C2 = 132, 192
    x2 = jax.random.normal(kx2, (N2, C2), dtype=jnp.float32)
    b2 = jax.random.normal(kb2, (C2,), dtype=jnp.float32) * 0.1
    ref2 = _ref(x2, b2)
    donated = jax.jit(
        lambda xx, bb: fused_leaky_relu(xx, bb, donate_input=True),
        donate_argnums=(0,),
    )
    out2 = jax.block_until_ready(donated(x2, b2))
    assert out2.shape == (N2, C2) and out2.dtype == jnp.float32
    assert jnp.allclose(out2, ref2, atol=1e-6, rtol=1e-6)

    # Case 3: bf16 activations (sublane packing = 16, f32 compute in-register).
    N3, C3 = 48, 256
    x3 = jax.random.normal(kx3, (N3, C3), dtype=jnp.float32).astype(jnp.bfloat16)
    b3 = (jax.random.normal(kb3, (C3,), dtype=jnp.float32) * 0.1)
    out3 = jax.block_until_ready(fused_leaky_relu(x3, b3))
    assert out3.shape == (N3, C3) and out3.dtype == jnp.bfloat16
    assert jnp.allclose(out3.astype(jnp.float32),
                        _ref(x3, b3).astype(jnp.float32), atol=2e-2, rtol=2e-2)

    print("KERNEL_OK")
</pallas_src>

<mosaic_0001>
module attributes {stable_mosaic.version = 11 : i64} {
  func.func @_kernel(%arg0: i32, %arg1: i32, %arg2: memref<2x128xf32, #tpu.memory_space<vmem>>, %arg3: memref<1x128xf32, #tpu.memory_space<vmem>>, %arg4: memref<2x128xf32, #tpu.memory_space<vmem>>) attributes {dimension_semantics = [#tpu.dimension_semantics<parallel>, #tpu.dimension_semantics<parallel>], iteration_bounds = array<i64: 1, 1>, scalar_prefetch = 0 : i64, scratch_operands = 0 : i64, tpu.core_type = #tpu.core_type<tc>, window_params = [{transform_indices = @transform_0, window_bounds = array<i64: 2, 128>}, {transform_indices = @transform_1, window_bounds = array<i64: 1, 128>}, {transform_indices = @transform_2, window_bounds = array<i64: 2, 128>}]} {
    %c0 = arith.constant 0 : index
    %c0_0 = arith.constant 0 : index
    %0 = vector.load %arg2[%c0, %c0_0] : memref<2x128xf32, #tpu.memory_space<vmem>>, vector<2x128xf32>
    %c0_1 = arith.constant 0 : index
    %c0_2 = arith.constant 0 : index
    %1 = vector.load %arg3[%c0_1, %c0_2] : memref<1x128xf32, #tpu.memory_space<vmem>>, vector<1x128xf32>
    %2 = vector.broadcast %1 : vector<1x128xf32> to vector<2x128xf32>
    %3 = arith.addf %0, %2 : vector<2x128xf32>
    %cst = arith.constant 0.000000e+00 : f32
    %4 = vector.broadcast %cst : f32 to vector<2x128xf32>
    %5 = arith.cmpf oge, %3, %4 : vector<2x128xf32>
    %cst_3 = arith.constant 2.000000e-01 : f32
    %6 = vector.broadcast %cst_3 : f32 to vector<2x128xf32>
    %7 = arith.mulf %3, %6 : vector<2x128xf32>
    %8 = arith.select %5, %3, %7 : vector<2x128xi1>, vector<2x128xf32>
    %cst_4 = arith.constant 1.41421354 : f32
    %9 = vector.broadcast %cst_4 : f32 to vector<2x128xf32>
    %10 = arith.mulf %8, %9 : vector<2x128xf32>
    %c0_5 = arith.constant 0 : index
    %c0_6 = arith.constant 0 : index
    %11 = vector.load %arg4[%c0_5, %c0_6] : memref<2x128xf32, #tpu.memory_space<vmem>>, vector<2x128xf32>
    tpu.vector_store %arg4[%c0_5, %c0_6], %10 {strides = array<i32>} : memref<2x128xf32, #tpu.memory_space<vmem>>, vector<2x128xf32>,
    return
  }
  func.func @transform_0(%arg0: i32, %arg1: i32) -> (i32, i32) {
    %c0_i32 = arith.constant 0 : i32
    return %arg0, %arg1 : i32, i32
  }
  func.func @transform_1(%arg0: i32, %arg1: i32) -> (i32, i32) {
    %c0_i32 = arith.constant 0 : i32
    %c0_i32_0 = arith.constant 0 : i32
    return %c0_i32, %arg1 : i32, i32
  }
  func.func @transform_2(%arg0: i32, %arg1: i32) -> (i32, i32) {
    %c0_i32 = arith.constant 0 : i32
    return %arg0, %arg1 : i32, i32
  }
}

</mosaic_0001>

<bundles_post_ra>
// kernel: tpu_custom_call.1
= control target key start
LH: loop header
LB: loop body
LE: loop exit
PB: predicated region body
PF: predicated region fallthrough
CT: control target
= control target key end

     0   :  { %7 = vsyncpa [#allocation3], 0  ;;  %s148_s0 = inlined_call_operand.hbm [shape: f32[2,128], index: 0, kind: input, shape index: {}]   ;;  %s149_s1 = inlined_call_operand.vmem [shape: f32[1,128], index: 1, kind: input, shape index: {}]   ;;  %s150_s2 = inlined_call_operand.hbm [shape: f32[2,128], index: 2, kind: output, shape index: {}]  }
   0x1   :  { %8 = vsyncpa [#allocation4], 0  ;;  %s104_s9 = smov [#allocation2]   ;;  %s56_s13 = scalar_lea.hbm %s148_s0, 32 }
   0x2   :  { %s15_s10 = sshll.u32 %s104_s9, 4  ;;  %p57_p0 = scmp.ne.s32.totalorder %s148_s0, %s56_s13  ;;  %s16_s10 = int_to_ptr.vmem [resolvable:$true] %s15_s10 }
   0x3   :  { %p60_p1 = scmp.lt.u32.totalorder %s56_s13, %s148_s0 }
   0x5   :  { %p62_p2 = pnand %p60_p1, %p57_p0 }
   0x7   :  { %65 = shalt.err (!%p62_p2)
}
   0x8   :  { %s66_s18 = scalar_lea.vmem %s16_s10, 32  ;;  %p71_p4 = scmp.lt.s32.totalorder %s16_s10, %s16_s10 }
   0x9   :  { %p67_p3 = scmp.ne.s32.totalorder %s16_s10, %s66_s18  ;;  %p72_p5 = scmp.lt.s32.totalorder %s66_s18, %s66_s18 }
   0xb   :  { %p73_p6 = por %p72_p5, %p71_p4 }
   0xd   :  { %p74_p7 = pnand %p73_p6, %p67_p3 }
   0xf   :  { %77 = shalt.err (!%p74_p7)
}
  0x10   :  { %18 = dma.hbm_to_vmem [thread:$0]  %s148_s0, 32, %s16_s10, [#allocation3]  }
  0x11   :  { %100 = dma.done.wait [#allocation3], 32  }
  0x12   :  { %101 = vsyncadd [#allocation3], 4294967264  ;;  %v24_v0 = vld [vmem:[#allocation2] sm:$0x3]  ;;  %s105_s23 = smov [#allocation5]  }
  0x13   :  { %v53_v1 = vld [vmem:[%s149_s1] ss:$0 sm:$0xff]  ;;  %s44_s24 = sshll.u32 %s105_s23, 4  ;;  %s45_s24 = int_to_ptr.vmem [resolvable:$true] %s44_s24 }
  0x14   :  { %v32_v2 = vadd.f32 %v53_v1, %v24_v0  ;;  %s78_s25 = scalar_lea.vmem %s45_s24, 32  ;;  %p83_p9 = scmp.lt.s32.totalorder %s45_s24, %s45_s24 }
  0x15   :  { %p79_p8 = scmp.ne.s32.totalorder %s45_s24, %s78_s25  ;;  %p84_p10 = scmp.lt.s32.totalorder %s78_s25, %s78_s25 }
  0x16   :  { %vm33_vm0 = vcmp.ge.f32.partialorder %v32_v2, 0.0  ;;  %v34_v3 = vmul.f32 0.2, %v32_v2 }
  0x17   :  { %p85_p11 = por %p84_p10, %p83_p9 }
  0x18   :  { %v35_v4 = vsel %vm33_vm0, %v32_v2, %v34_v3 }
  0x19   :  { %v36_v5 = vmul.f32 1.4142135, %v35_v4  ;;  %p86_p12 = pnand %p85_p11, %p79_p8 }
  0x1b   :  { %37 = vst [vmem:[#allocation5] sm:$0x3] %v36_v5 }
  0x1c   :  { %89 = shalt.err (!%p86_p12)
}
  0x1d   :  { %s90_s1 = scalar_lea.hbm %s150_s2, 32 }
  0x1e   :  { %p91_p13 = scmp.ne.s32.totalorder %s150_s2, %s90_s1  ;;  %p94_p0 = scmp.lt.u32.totalorder %s90_s1, %s150_s2 }
  0x20   :  { %p96_p1 = pnand %p94_p0, %p91_p13 }
  0x22   :  { %99 = shalt.err (!%p96_p1)
}
  0x23   :  { %47 = dma.vmem_to_hbm [thread:$0]  %s45_s24, 32, %s150_s2, [#allocation4]  }
  0x24   :  { %102 = dma.done.wait [#allocation4], 32  }
  0x25   :  { %103 = vsyncadd [#allocation4], 4294967264 }
  0x26   :  { %51 = vsyncpa [#allocation3], 1 }
  0x27   :  { %52 = vsyncpa [#allocation4], 1 }

</bundles_post_ra>
